<compile_context>
chip_gen: v7x
topology: tpu7x:2x2x1
jax: 0.10.0
libtpu: 0.0.40
codegen_flags: <defaults>
</compile_context>

<pallas_src>
import functools

import jax
import jax.numpy as jnp
from jax.experimental import pallas as pl
from jax.experimental.pallas import tpu as pltpu


_VMEM_LIMIT = 48 * 1024 * 1024  # headroom below v7x's 64 MiB physical VMEM


def _pick_tile(n, max_tile):
    """Largest tile <= max_tile that divides n and is a multiple of 8 (else n)."""
    if n <= max_tile:
        return n
    t = (max_tile // 8) * 8
    while t >= 8:
        if n % t == 0:
            return t
        t -= 8
    return n


# ---------------------------------------------------------------------------
# Row-tiled linear layer: y = x @ W_T + b   (W_T pre-transposed host-side).
# ---------------------------------------------------------------------------
def _linear_kernel(x_ref, wt_ref, b_ref, o_ref):
    acc = jnp.dot(x_ref[...], wt_ref[...], preferred_element_type=jnp.float32)
    o_ref[...] = (acc + b_ref[...]).astype(o_ref.dtype)


def _linear(x2d, w_t, b, out_dtype, *, max_rows=512):
    n, h_in = x2d.shape
    h_out = w_t.shape[1]
    tr = _pick_tile(n, max_rows)
    return pl.pallas_call(
        _linear_kernel,
        out_shape=jax.ShapeDtypeStruct((n, h_out), out_dtype),
        grid_spec=pltpu.PrefetchScalarGridSpec(
            num_scalar_prefetch=0,
            grid=(n // tr,),
            in_specs=[
                pl.BlockSpec((tr, h_in), lambda i: (i, 0)),
                pl.BlockSpec((h_in, h_out), lambda i: (0, 0)),  # weight resident
                pl.BlockSpec((1, h_out), lambda i: (0, 0)),
            ],
            out_specs=pl.BlockSpec((tr, h_out), lambda i: (i, 0)),
        ),
        compiler_params=pltpu.CompilerParams(
            dimension_semantics=("parallel",),
            vmem_limit_bytes=_VMEM_LIMIT),
    )(x2d, w_t, b)


# ---------------------------------------------------------------------------
# Attention kernel: batched over heads, tiled over (batch, query tiles).
# ---------------------------------------------------------------------------
def _attn_kernel(has_mask, q_ref, k_ref, v_ref, *rest):
    if has_mask:
        mask_ref, ctx_ref, attn_ref = rest
    else:
        ctx_ref, attn_ref = rest

    q = q_ref[0]                       # (n_heads, tq, head_dim)  bf16
    k = k_ref[0]                       # (n_heads, Sk, head_dim)  bf16
    v = v_ref[0]                       # (n_heads, Sk, head_dim)  bf16

    # 1/sqrt(head_dim) is already folded into the Q projection weights.
    energy = jnp.einsum("hqd,hkd->hqk", q, k,
                        preferred_element_type=jnp.float32)     # (h, tq, Sk) f32
    if has_mask:
        # masked_fill(mask == 0, -1e10), applied once on the batched energy.
        energy = jnp.where(mask_ref[...] == 0, jnp.float32(-1e10), energy)

    m = jnp.max(energy, axis=-1, keepdims=True)
    p = jnp.exp(energy - m)
    l = jnp.sum(p, axis=-1, keepdims=True)
    attn = p * pl.reciprocal(l, approx=True)                    # EUP reciprocal
    attn_ref[0] = attn.astype(attn_ref.dtype)

    # dropout(attention) is identity in eval mode.
    # TODO(synk): training-mode dropout (pltpu.prng_*) not implemented.
    ctx = jnp.einsum("hqk,hkd->hqd", attn.astype(v.dtype), v,
                     preferred_element_type=jnp.float32)
    ctx_ref[0] = ctx.astype(ctx_ref.dtype)


def _attention(q, k, v, mask, attn_dtype, compute_dtype, *, max_q_tile=256):
    b, h, sq, d = q.shape
    sk = k.shape[2]
    tq = _pick_tile(sq, max_q_tile)
    has_mask = mask is not None

    in_specs = [
        pl.BlockSpec((1, h, tq, d), lambda bi, qi: (bi, 0, qi, 0)),
        pl.BlockSpec((1, h, sk, d), lambda bi, qi: (bi, 0, 0, 0)),
        pl.BlockSpec((1, h, sk, d), lambda bi, qi: (bi, 0, 0, 0)),
    ]
    operands = [q, k, v]
    if has_mask:
        in_specs.append(pl.BlockSpec((1, tq, sk), lambda bi, qi: (bi, qi, 0)))
        operands.append(mask)

    ctx, attn = pl.pallas_call(
        functools.partial(_attn_kernel, has_mask),
        out_shape=(
            jax.ShapeDtypeStruct((b, h, sq, d), compute_dtype),   # context
            jax.ShapeDtypeStruct((b, h, sq, sk), attn_dtype),     # attention
        ),
        grid_spec=pltpu.PrefetchScalarGridSpec(
            num_scalar_prefetch=0,
            grid=(b, sq // tq),
            in_specs=in_specs,
            out_specs=[
                pl.BlockSpec((1, h, tq, d), lambda bi, qi: (bi, 0, qi, 0)),
                pl.BlockSpec((1, h, tq, sk), lambda bi, qi: (bi, 0, qi, 0)),
            ],
        ),
        compiler_params=pltpu.CompilerParams(
            dimension_semantics=("parallel", "parallel"),
            vmem_limit_bytes=_VMEM_LIMIT),
    )(*operands)
    return ctx, attn


# ---------------------------------------------------------------------------
# Full module forward.
# ---------------------------------------------------------------------------
def multi_head_attention(query, key, value, params, n_heads, mask=None, *,
                         compute_dtype=jnp.bfloat16, attn_dtype=None):
    """query/key/value: [B, S, H]. Returns (x:[B,Sq,H], attention:[B,n_heads,Sq,Sk])."""
    b, sq, h = query.shape
    sk = key.shape[1]
    if h % n_heads != 0:
        raise ValueError(f"hidden_dim={h} not divisible by n_heads={n_heads}")
    head_dim = h // n_heads
    out_dtype = query.dtype
    # Pass attn_dtype=jnp.bfloat16 to halve the dominant HBM writeback.
    attn_dtype = out_dtype if attn_dtype is None else attn_dtype

    wq, bq, wk, bk, wv, bv, wo, bo = params
    scale = jnp.sqrt(jnp.float32(head_dim))

    # Pre-transposed weights (x @ W_T); 1/scale folded into the Q projection.
    wq_t = (wq.T / scale).astype(compute_dtype)
    wk_t = wk.T.astype(compute_dtype)
    wv_t = wv.T.astype(compute_dtype)
    wo_t = wo.T.astype(compute_dtype)
    bq_s = (bq / scale).reshape(1, h).astype(jnp.float32)
    bk_r = bk.reshape(1, h).astype(jnp.float32)
    bv_r = bv.reshape(1, h).astype(jnp.float32)
    bo_r = bo.reshape(1, h).astype(jnp.float32)

    xq = query.astype(compute_dtype).reshape(b * sq, h)
    xk = key.astype(compute_dtype).reshape(b * sk, h)
    xv = value.astype(compute_dtype).reshape(b * sk, h)

    def split_heads(t, s):   # host-side layout plumbing (XLA copy)
        return t.reshape(b, s, n_heads, head_dim).transpose(0, 2, 1, 3)

    q = split_heads(_linear(xq, wq_t, bq_s, compute_dtype), sq)
    k = split_heads(_linear(xk, wk_t, bk_r, compute_dtype), sk)
    v = split_heads(_linear(xv, wv_t, bv_r, compute_dtype), sk)

    if mask is not None:
        mask = jnp.asarray(mask)
        if mask.ndim == 4:            # (B, 1, Sq, Sk) transformer convention
            mask = mask[:, 0]
        mask = jnp.broadcast_to(mask.astype(jnp.int32), (b, sq, sk))

    ctx, attn = _attention(q, k, v, mask, attn_dtype, compute_dtype)

    ctx2d = ctx.transpose(0, 2, 1, 3).reshape(b * sq, h)   # merge heads
    x = _linear(ctx2d, wo_t, bo_r, out_dtype).reshape(b, sq, h)
    return x, attn


# ---------------------------------------------------------------------------
# Demo / self-check.
# ---------------------------------------------------------------------------
def init_params(key, hidden_dim):
    ks = jax.random.split(key, 8)
    s = 1.0 / jnp.sqrt(hidden_dim)
    def lin(kw, kb):
        w = jax.random.uniform(kw, (hidden_dim, hidden_dim), jnp.float32, -s, s)
        bias = jax.random.uniform(kb, (hidden_dim,), jnp.float32, -s, s)
        return w, bias
    wq, bq = lin(ks[0], ks[1]); wk, bk = lin(ks[2], ks[3])
    wv, bv = lin(ks[4], ks[5]); wo, bo = lin(ks[6], ks[7])
    return (wq, bq, wk, bk, wv, bv, wo, bo)


def _reference(query, key, value, params, n_heads, mask=None):
    wq, bq, wk, bk, wv, bv, wo, bo = params
    b, sq, h = query.shape
    sk = key.shape[1]
    d = h // n_heads
    q = query @ wq.T + bq
    k = key @ wk.T + bk
    v = value @ wv.T + bv
    def split(t, s):
        return t.reshape(b, s, n_heads, d).transpose(0, 2, 1, 3)
    qh, kh, vh = split(q, sq), split(k, sk), split(v, sk)
    e = jnp.einsum("bhqd,bhkd->bhqk", qh, kh) / jnp.sqrt(jnp.float32(d))
    if mask is not None:
        m = jnp.broadcast_to(jnp.asarray(mask), (b, sq, sk))
        e = jnp.where(m[:, None, :, :] == 0, -1e10, e)
    a = jax.nn.softmax(e, axis=-1)
    c = jnp.einsum("bhqk,bhkd->bhqd", a, vh)
    c = c.transpose(0, 2, 1, 3).reshape(b, sq, h)
    return c @ wo.T + bo, a


if __name__ == "__main__":
    B, S, H, N_HEADS = 2, 8, 32, 4
    root = jax.random.PRNGKey(0)
    kq, kk, kv, kp = jax.random.split(root, 4)

    query = jax.random.normal(kq, (B, S, H), jnp.float32)
    key_in = jax.random.normal(kk, (B, S, H), jnp.float32)
    value = jax.random.normal(kv, (B, S, H), jnp.float32)
    params = init_params(kp, H)

    mha = jax.jit(multi_head_attention, static_argnames=("n_heads",))

    # No-mask path (mask is specialized away — no all-ones tensor over HBM).
    x, attn = mha(query, key_in, value, params, n_heads=N_HEADS)
    # Masked path (causal mask).
    causal = jnp.tril(jnp.ones((S, S), jnp.int32))
    xm, attnm = mha(query, key_in, value, params, n_heads=N_HEADS, mask=causal)
    jax.block_until_ready((x, attn, xm, attnm))

    x_ref, a_ref = _reference(query, key_in, value, params, N_HEADS)
    xm_ref, am_ref = _reference(query, key_in, value, params, N_HEADS, mask=causal)

    # bf16 matmul operands (f32 accumulation) → tolerances sized for bf16.
    assert float(jnp.max(jnp.abs(x - x_ref))) < 0.1, "output mismatch (no mask)"
    assert float(jnp.max(jnp.abs(attn.astype(jnp.float32) - a_ref))) < 0.05, \
        "attention mismatch (no mask)"
    assert float(jnp.max(jnp.abs(xm - xm_ref))) < 0.1, "output mismatch (mask)"
    assert float(jnp.max(jnp.abs(attnm.astype(jnp.float32) - am_ref))) < 0.05, \
        "attention mismatch (mask)"

    print("KERNEL_OK")
</pallas_src>

<mosaic_0001>
module attributes {stable_mosaic.version = 11 : i64} {
  func.func @_linear_kernel(%arg0: i32, %arg1: memref<16x32xbf16, #tpu.memory_space<vmem>>, %arg2: memref<32x32xbf16, #tpu.memory_space<vmem>>, %arg3: memref<1x32xf32, #tpu.memory_space<vmem>>, %arg4: memref<16x32xbf16, #tpu.memory_space<vmem>>) attributes {dimension_semantics = [#tpu.dimension_semantics<parallel>], iteration_bounds = array<i64: 1>, scalar_prefetch = 0 : i64, scratch_operands = 0 : i64, tpu.core_type = #tpu.core_type<tc>, window_params = [{transform_indices = @transform_0, window_bounds = array<i64: 16, 32>}, {pipeline_mode = #tpu.pipeline_mode<synchronous>, transform_indices = @transform_1, window_bounds = array<i64: 32, 32>}, {pipeline_mode = #tpu.pipeline_mode<synchronous>, transform_indices = @transform_2, window_bounds = array<i64: 1, 32>}, {transform_indices = @transform_3, window_bounds = array<i64: 16, 32>}]} {
    %c0 = arith.constant 0 : index
    %c0_0 = arith.constant 0 : index
    %0 = vector.load %arg1[%c0, %c0_0] : memref<16x32xbf16, #tpu.memory_space<vmem>>, vector<16x32xbf16>
    %c0_1 = arith.constant 0 : index
    %c0_2 = arith.constant 0 : index
    %1 = vector.load %arg2[%c0_1, %c0_2] : memref<32x32xbf16, #tpu.memory_space<vmem>>, vector<32x32xbf16>
    %cst = arith.constant dense<0.000000e+00> : vector<16x32xf32>
    %2 = tpu.matmul %0, %1, %cst {dimension_numbers = #tpu.dot_dimension_numbers<[1], [0], [0], [1], [0, 0, 1, 1], [], []>} : vector<16x32xbf16>, vector<32x32xbf16>, vector<16x32xf32> -> vector<16x32xf32>
    %c0_3 = arith.constant 0 : index
    %c0_4 = arith.constant 0 : index
    %3 = vector.load %arg3[%c0_3, %c0_4] : memref<1x32xf32, #tpu.memory_space<vmem>>, vector<1x32xf32>
    %4 = vector.broadcast %3 : vector<1x32xf32> to vector<16x32xf32>
    %5 = arith.addf %2, %4 : vector<16x32xf32>
    %6 = arith.truncf %5 : vector<16x32xf32> to vector<16x32xbf16>
    %c0_5 = arith.constant 0 : index
    %c0_6 = arith.constant 0 : index
    %7 = vector.load %arg4[%c0_5, %c0_6] : memref<16x32xbf16, #tpu.memory_space<vmem>>, vector<16x32xbf16>
    tpu.vector_store %arg4[%c0_5, %c0_6], %6 {strides = array<i32>} : memref<16x32xbf16, #tpu.memory_space<vmem>>, vector<16x32xbf16>,
    return
  }
  func.func @transform_0(%arg0: i32) -> (i32, i32) {
    %c0_i32 = arith.constant 0 : i32
    %c0_i32_0 = arith.constant 0 : i32
    return %arg0, %c0_i32 : i32, i32
  }
  func.func @transform_1(%arg0: i32) -> (i32, i32) {
    %c0_i32 = arith.constant 0 : i32
    %c0_i32_0 = arith.constant 0 : i32
    %c0_i32_1 = arith.constant 0 : i32
    return %c0_i32, %c0_i32_0 : i32, i32
  }
  func.func @transform_2(%arg0: i32) -> (i32, i32) {
    %c0_i32 = arith.constant 0 : i32
    %c0_i32_0 = arith.constant 0 : i32
    %c0_i32_1 = arith.constant 0 : i32
    return %c0_i32, %c0_i32_0 : i32, i32
  }
  func.func @transform_3(%arg0: i32) -> (i32, i32) {
    %c0_i32 = arith.constant 0 : i32
    %c0_i32_0 = arith.constant 0 : i32
    return %arg0, %c0_i32 : i32, i32
  }
}

module attributes {stable_mosaic.version = 11 : i64} {
  func.func @_attn_kernel(%arg0: i32, %arg1: i32, %arg2: memref<1x4x8x8xbf16, #tpu.memory_space<vmem>>, %arg3: memref<1x4x8x8xbf16, #tpu.memory_space<vmem>>, %arg4: memref<1x4x8x8xbf16, #tpu.memory_space<vmem>>, %arg5: memref<1x4x8x8xbf16, #tpu.memory_space<vmem>>, %arg6: memref<1x4x8x8xf32, #tpu.memory_space<vmem>>) attributes {dimension_semantics = [#tpu.dimension_semantics<parallel>, #tpu.dimension_semantics<parallel>], iteration_bounds = array<i64: 2, 1>, scalar_prefetch = 0 : i64, scratch_operands = 0 : i64, tpu.core_type = #tpu.core_type<tc>, window_params = [{transform_indices = @transform_0, window_bounds = array<i64: 1, 4, 8, 8>}, {transform_indices = @transform_1, window_bounds = array<i64: 1, 4, 8, 8>}, {transform_indices = @transform_2, window_bounds = array<i64: 1, 4, 8, 8>}, {transform_indices = @transform_3, window_bounds = array<i64: 1, 4, 8, 8>}, {transform_indices = @transform_4, window_bounds = array<i64: 1, 4, 8, 8>}]} {
    %c0 = arith.constant 0 : index
    %c0_0 = arith.constant 0 : index
    %c0_1 = arith.constant 0 : index
    %c0_2 = arith.constant 0 : index
    %0 = vector.load %arg2[%c0, %c0_0, %c0_1, %c0_2] : memref<1x4x8x8xbf16, #tpu.memory_space<vmem>>, vector<1x4x8x8xbf16>
    %1 = vector.shape_cast %0 : vector<1x4x8x8xbf16> to vector<4x8x8xbf16>
    %c0_3 = arith.constant 0 : index
    %c0_4 = arith.constant 0 : index
    %c0_5 = arith.constant 0 : index
    %c0_6 = arith.constant 0 : index
    %2 = vector.load %arg3[%c0_3, %c0_4, %c0_5, %c0_6] : memref<1x4x8x8xbf16, #tpu.memory_space<vmem>>, vector<1x4x8x8xbf16>
    %3 = vector.shape_cast %2 : vector<1x4x8x8xbf16> to vector<4x8x8xbf16>
    %c0_7 = arith.constant 0 : index
    %c0_8 = arith.constant 0 : index
    %c0_9 = arith.constant 0 : index
    %c0_10 = arith.constant 0 : index
    %4 = vector.load %arg4[%c0_7, %c0_8, %c0_9, %c0_10] : memref<1x4x8x8xbf16, #tpu.memory_space<vmem>>, vector<1x4x8x8xbf16>
    %5 = vector.shape_cast %4 : vector<1x4x8x8xbf16> to vector<4x8x8xbf16>
    "tpu.trace_start"() <{level = 10 : i32, message = "hqd,hkd->hqk"}> : () -> ()
    %cst = arith.constant dense<0.000000e+00> : vector<4x8x8xf32>
    %6 = tpu.matmul %1, %3, %cst {dimension_numbers = #tpu.dot_dimension_numbers<[2], [2], [1], [1], [0, 0, 0, 1, 1, 1], [0], [0]>} : vector<4x8x8xbf16>, vector<4x8x8xbf16>, vector<4x8x8xf32> -> vector<4x8x8xf32>
    "tpu.trace_stop"() : () -> ()
    %cst_11 = arith.constant dense<0xFF800000> : vector<4x8xf32>
    %7 = vector.multi_reduction <maximumf>, %6, %cst_11 [2] : vector<4x8x8xf32> to vector<4x8xf32>
    %8 = vector.shape_cast %7 : vector<4x8xf32> to vector<4x8x1xf32>
    %9 = vector.broadcast %8 : vector<4x8x1xf32> to vector<4x8x8xf32>
    %10 = arith.subf %6, %9 : vector<4x8x8xf32>
    %11 = math.exp %10 : vector<4x8x8xf32>
    %cst_12 = arith.constant dense<0.000000e+00> : vector<4x8xf32>
    %12 = vector.multi_reduction <add>, %11, %cst_12 [2] : vector<4x8x8xf32> to vector<4x8xf32>
    %13 = vector.shape_cast %12 : vector<4x8xf32> to vector<4x8x1xf32>
    %14 = tpu.reciprocal %13 {approx = true} : vector<4x8x1xf32> -> vector<4x8x1xf32>
    %15 = vector.broadcast %14 : vector<4x8x1xf32> to vector<4x8x8xf32>
    %16 = arith.mulf %11, %15 : vector<4x8x8xf32>
    %c0_13 = arith.constant 0 : index
    %c0_14 = arith.constant 0 : index
    %c0_15 = arith.constant 0 : index
    %c0_16 = arith.constant 0 : index
    %17 = vector.load %arg6[%c0_13, %c0_14, %c0_15, %c0_16] : memref<1x4x8x8xf32, #tpu.memory_space<vmem>>, vector<1x4x8x8xf32>
    %18 = vector.shape_cast %17 : vector<1x4x8x8xf32> to vector<4x8x8xf32>
    %19 = vector.shape_cast %16 : vector<4x8x8xf32> to vector<1x4x8x8xf32>
    tpu.vector_store %arg6[%c0_13, %c0_14, %c0_15, %c0_16], %19 {strides = array<i32>} : memref<1x4x8x8xf32, #tpu.memory_space<vmem>>, vector<1x4x8x8xf32>,
    %20 = arith.truncf %16 : vector<4x8x8xf32> to vector<4x8x8xbf16>
    "tpu.trace_start"() <{level = 10 : i32, message = "hqk,hkd->hqd"}> : () -> ()
    %cst_17 = arith.constant dense<0.000000e+00> : vector<4x8x8xf32>
    %21 = tpu.matmul %20, %5, %cst_17 {dimension_numbers = #tpu.dot_dimension_numbers<[2], [1], [1], [2], [0, 0, 0, 1, 1, 2], [0], [0]>} : vector<4x8x8xbf16>, vector<4x8x8xbf16>, vector<4x8x8xf32> -> vector<4x8x8xf32>
    "tpu.trace_stop"() : () -> ()
    %22 = arith.truncf %21 : vector<4x8x8xf32> to vector<4x8x8xbf16>
    %c0_18 = arith.constant 0 : index
    %c0_19 = arith.constant 0 : index
    %c0_20 = arith.constant 0 : index
    %c0_21 = arith.constant 0 : index
    %23 = vector.load %arg5[%c0_18, %c0_19, %c0_20, %c0_21] : memref<1x4x8x8xbf16, #tpu.memory_space<vmem>>, vector<1x4x8x8xbf16>
    %24 = vector.shape_cast %23 : vector<1x4x8x8xbf16> to vector<4x8x8xbf16>
    %25 = vector.shape_cast %22 : vector<4x8x8xbf16> to vector<1x4x8x8xbf16>
    tpu.vector_store %arg5[%c0_18, %c0_19, %c0_20, %c0_21], %25 {strides = array<i32>} : memref<1x4x8x8xbf16, #tpu.memory_space<vmem>>, vector<1x4x8x8xbf16>,
    return
  }
  func.func @transform_0(%arg0: i32, %arg1: i32) -> (i32, i32, i32, i32) {
    %c0_i32 = arith.constant 0 : i32
    %c0_i32_0 = arith.constant 0 : i32
    %c0_i32_1 = arith.constant 0 : i32
    return %arg0, %c0_i32, %arg1, %c0_i32_0 : i32, i32, i32, i32
  }
  func.func @transform_1(%arg0: i32, %arg1: i32) -> (i32, i32, i32, i32) {
    %c0_i32 = arith.constant 0 : i32
    %c0_i32_0 = arith.constant 0 : i32
    %c0_i32_1 = arith.constant 0 : i32
    %c0_i32_2 = arith.constant 0 : i32
    return %arg0, %c0_i32, %c0_i32_0, %c0_i32_1 : i32, i32, i32, i32
  }
  func.func @transform_2(%arg0: i32, %arg1: i32) -> (i32, i32, i32, i32) {
    %c0_i32 = arith.constant 0 : i32
    %c0_i32_0 = arith.constant 0 : i32
    %c0_i32_1 = arith.constant 0 : i32
    %c0_i32_2 = arith.constant 0 : i32
    return %arg0, %c0_i32, %c0_i32_0, %c0_i32_1 : i32, i32, i32, i32
  }
  func.func @transform_3(%arg0: i32, %arg1: i32) -> (i32, i32, i32, i32) {
    %c0_i32 = arith.constant 0 : i32
    %c0_i32_0 = arith.constant 0 : i32
    %c0_i32_1 = arith.constant 0 : i32
    return %arg0, %c0_i32, %arg1, %c0_i32_0 : i32, i32, i32, i32
  }
  func.func @transform_4(%arg0: i32, %arg1: i32) -> (i32, i32, i32, i32) {
    %c0_i32 = arith.constant 0 : i32
    %c0_i32_0 = arith.constant 0 : i32
    %c0_i32_1 = arith.constant 0 : i32
    return %arg0, %c0_i32, %arg1, %c0_i32_0 : i32, i32, i32, i32
  }
}

module attributes {stable_mosaic.version = 11 : i64} {
  func.func @_linear_kernel(%arg0: i32, %arg1: memref<16x32xbf16, #tpu.memory_space<vmem>>, %arg2: memref<32x32xbf16, #tpu.memory_space<vmem>>, %arg3: memref<1x32xf32, #tpu.memory_space<vmem>>, %arg4: memref<16x32xf32, #tpu.memory_space<vmem>>) attributes {dimension_semantics = [#tpu.dimension_semantics<parallel>], iteration_bounds = array<i64: 1>, scalar_prefetch = 0 : i64, scratch_operands = 0 : i64, tpu.core_type = #tpu.core_type<tc>, window_params = [{transform_indices = @transform_0, window_bounds = array<i64: 16, 32>}, {pipeline_mode = #tpu.pipeline_mode<synchronous>, transform_indices = @transform_1, window_bounds = array<i64: 32, 32>}, {pipeline_mode = #tpu.pipeline_mode<synchronous>, transform_indices = @transform_2, window_bounds = array<i64: 1, 32>}, {transform_indices = @transform_3, window_bounds = array<i64: 16, 32>}]} {
    %c0 = arith.constant 0 : index
    %c0_0 = arith.constant 0 : index
    %0 = vector.load %arg1[%c0, %c0_0] : memref<16x32xbf16, #tpu.memory_space<vmem>>, vector<16x32xbf16>
    %c0_1 = arith.constant 0 : index
    %c0_2 = arith.constant 0 : index
    %1 = vector.load %arg2[%c0_1, %c0_2] : memref<32x32xbf16, #tpu.memory_space<vmem>>, vector<32x32xbf16>
    %cst = arith.constant dense<0.000000e+00> : vector<16x32xf32>
    %2 = tpu.matmul %0, %1, %cst {dimension_numbers = #tpu.dot_dimension_numbers<[1], [0], [0], [1], [0, 0, 1, 1], [], []>} : vector<16x32xbf16>, vector<32x32xbf16>, vector<16x32xf32> -> vector<16x32xf32>
    %c0_3 = arith.constant 0 : index
    %c0_4 = arith.constant 0 : index
    %3 = vector.load %arg3[%c0_3, %c0_4] : memref<1x32xf32, #tpu.memory_space<vmem>>, vector<1x32xf32>
    %4 = vector.broadcast %3 : vector<1x32xf32> to vector<16x32xf32>
    %5 = arith.addf %2, %4 : vector<16x32xf32>
    %c0_5 = arith.constant 0 : index
    %c0_6 = arith.constant 0 : index
    %6 = vector.load %arg4[%c0_5, %c0_6] : memref<16x32xf32, #tpu.memory_space<vmem>>, vector<16x32xf32>
    tpu.vector_store %arg4[%c0_5, %c0_6], %5 {strides = array<i32>} : memref<16x32xf32, #tpu.memory_space<vmem>>, vector<16x32xf32>,
    return
  }
  func.func @transform_0(%arg0: i32) -> (i32, i32) {
    %c0_i32 = arith.constant 0 : i32
    %c0_i32_0 = arith.constant 0 : i32
    return %arg0, %c0_i32 : i32, i32
  }
  func.func @transform_1(%arg0: i32) -> (i32, i32) {
    %c0_i32 = arith.constant 0 : i32
    %c0_i32_0 = arith.constant 0 : i32
    %c0_i32_1 = arith.constant 0 : i32
    return %c0_i32, %c0_i32_0 : i32, i32
  }
  func.func @transform_2(%arg0: i32) -> (i32, i32) {
    %c0_i32 = arith.constant 0 : i32
    %c0_i32_0 = arith.constant 0 : i32
    %c0_i32_1 = arith.constant 0 : i32
    return %c0_i32, %c0_i32_0 : i32, i32
  }
  func.func @transform_3(%arg0: i32) -> (i32, i32) {
    %c0_i32 = arith.constant 0 : i32
    %c0_i32_0 = arith.constant 0 : i32
    return %arg0, %c0_i32 : i32, i32
  }
}

</mosaic_0001>

<bundles_post_ra>
// kernel: multi_head_attention.6
= control target key start
LH: loop header
LB: loop body
LE: loop exit
PB: predicated region body
PF: predicated region fallthrough
CT: control target
= control target key end

     0   :  { %v130_v0 = vmov 0.0   ;;  %vm131_vm0 = vmmov 0   ;;  %vm45_vm1 = vcmask 261120   ;;  %vm98_vm2 = vcmask 257024   ;;  %s170_s1 = inlined_call_operand.vmem [shape: bf16[32,32], index: 1, kind: input, shape index: {}]   ;;  %s171_s0 = inlined_call_operand.vmem [shape: bf16[16,32], index: 0, kind: input, shape index: {}]   ;;  %s172_s2 = inlined_call_operand.vmem [shape: f32[1,32], index: 2, kind: input, shape index: {}]   ;;  %s173_s3 = inlined_call_operand.vmem [shape: bf16[16,32], index: 3, kind: output, shape index: {}]  }
   0x1   :  { %117 = vmatprep.subr.bf16.mxu0 %v130_v0  ;;  %v127_v1 = vld [vmem:[%s170_s1] sm:$0xff]   ;;  %121 = vmatprep.mubr.msk.bf16.mxu0 %vm131_vm0, %v130_v0  ;;  %v128_v2 = vld [vmem:[%s170_s1 + $0x8] sm:$0xff]  }
   0x2   :  { %118 = vmatpush3.bf16.msra.mxu0 %v127_v1  ;;  %v129_v3 = vld [vmem:[%s171_s0] sm:$0xff]  }
   0x3   :  { %119 = vmatprep.subr.bf16.mxu0 %v130_v0  ;;  %v105_v4 = vld [vmem:[%s172_s2] ss:$0 sm:$0xff] }
   0x6   :  { %120 = vmatpush3.bf16.msra.mxu0 %v128_v2 }
   0x9   :  { %122 = vmatmul.mubr.msk.bf16.vlgmr.msra.gmra.mrb[0].mxu0 %vm45_vm1, %v129_v3 }
  0xdc   :  { %v83_v5 = vpop.f32.mrb[0].mxu0 }
  0xdd   :  { %v84_v6 = vadd.f32 %v105_v4, %v83_v5  ;;  %v123_v7 = vpop.f32.mrb[1].mxu0 }
  0xde   :  { %v86_v8 = vpop.f32.mrb[2].mxu0 }
  0xdf   :  { %v112_v9 = vpack.c.bf16 %v84_v6, %v84_v6  ;;  %v87_v10 = vadd.f32 %v105_v4, %v86_v8  ;;  %v124_v11 = vpop.f32.mrb[3].mxu0 }
  0xe1   :  { %99 = vst.msk [vmem:[%s173_s3] sm:$0xf] %vm98_vm2, %v112_v9  ;;  %v113_v12 = vpack.c.bf16 %v87_v10, %v87_v10 }
  0xe3   :  { %100 = vst.msk [vmem:[%s173_s3 + $0x4] sm:$0xf] %vm98_vm2, %v113_v12 }

// kernel: multi_head_attention.9
= control target key start
LH: loop header
LB: loop body
LE: loop exit
PB: predicated region body
PF: predicated region fallthrough
CT: control target
= control target key end

     0   :  { %v157_v1 = vmov 0.0   ;;  %vm158_vm0 = vmmov 0   ;;  %s206_s0 = inlined_call_operand.vmem [shape: bf16[16,32], index: 0, kind: input, shape index: {}]   ;;  %s207_s1 = inlined_call_operand.vmem [shape: bf16[32,32], index: 1, kind: input, shape index: {}]   ;;  %s208_s2 = inlined_call_operand.vmem [shape: f32[1,32], index: 2, kind: input, shape index: {}]   ;;  %s209_s3 = inlined_call_operand.hbm [shape: f32[16,32], index: 3, kind: output, shape index: {}]  }
   0x1   :  { %v130_v0 = vld [vmem:[%s207_s1] sm:$0xff]   ;;  %117 = vmatprep.subr.bf16.mxu0 %v157_v1  ;;  %v131_v2 = vld [vmem:[%s207_s1 + $0x8] sm:$0xff]   ;;  %121 = vmatprep.mubr.msk.bf16.mxu0 %vm158_vm0, %v157_v1 }
   0x2   :  { %118 = vmatpush3.bf16.msra.mxu0 %v130_v0 }
   0x3   :  { %119 = vmatprep.subr.bf16.mxu0 %v157_v1 }
   0x4   :  { %8 = vsyncpa [#allocation3], 0  ;;  %v132_v3 = vld [vmem:[%s206_s0] sm:$0xff]   ;;  %vm46_vm1 = vcmask 261120   ;;  %s159_s20 = smov [#allocation2]  }
   0x5   :  { %v109_v4 = vld [vmem:[%s208_s2] ss:$0 sm:$0xff]  ;;  %s98_s21 = sshll.u32 %s159_s20, 4  ;;  %s99_s21 = int_to_ptr.vmem [resolvable:$true] %s98_s21 }
   0x6   :  { %120 = vmatpush3.bf16.msra.mxu0 %v131_v2  ;;  %s133_s1 = scalar_lea.vmem %s99_s21, 256  ;;  %p138_p1 = scmp.lt.s32.totalorder %s99_s21, %s99_s21 }
   0x7   :  { %p134_p0 = scmp.ne.s32.totalorder %s99_s21, %s133_s1  ;;  %p139_p2 = scmp.lt.s32.totalorder %s133_s1, %s133_s1 }
   0x9   :  { %122 = vmatmul.mubr.msk.bf16.vlgmr.msra.gmra.mrb[0].mxu0 %vm46_vm1, %v132_v3  ;;  %p140_p3 = por %p139_p2, %p138_p1 }
   0xb   :  { %p141_p4 = pnand %p140_p3, %p134_p0 }
  0xdc   :  { %v84_v5 = vpop.f32.mrb[0].mxu0 }
  0xdd   :  { %v85_v6 = vadd.f32 %v109_v4, %v84_v5  ;;  %v123_v7 = vpop.f32.mrb[1].mxu0 }
  0xde   :  { %v87_v8 = vpop.f32.mrb[2].mxu0 }
  0xdf   :  { %91 = vst.msk [vmem:[#allocation2] sm:$0xff] %vm46_vm1, %v85_v6  ;;  %v88_v9 = vadd.f32 %v109_v4, %v87_v8  ;;  %v124_v10 = vpop.f32.mrb[3].mxu0 }
  0xe1   :  { %92 = vst.msk [vmem:[#allocation2 + $0x8] sm:$0xff] %vm46_vm1, %v88_v9 }
  0xe2   :  { %144 = shalt.err (!%p141_p4)
}
  0xe3   :  { %s145_s22 = scalar_lea.hbm %s209_s3, 256 }
  0xe4   :  { %p146_p5 = scmp.ne.s32.totalorder %s209_s3, %s145_s22  ;;  %p149_p6 = scmp.lt.u32.totalorder %s145_s22, %s209_s3 }
  0xe6   :  { %p151_p7 = pnand %p149_p6, %p146_p5 }
  0xe8   :  { %154 = shalt.err (!%p151_p7)
}
  0xe9   :  { %s160_s27 = smov 128   ;;  %s161_s28 = smov 8  }
  0xea   :  { %104 = dma.vmem_to_hbm [thread:$0]  %s99_s21, 256, %s209_s3, [#allocation3], %s160_s27, %s160_s27, %s161_s28  }
  0xeb   :  { %155 = dma.done.wait [#allocation3], 256  }
  0xec   :  { %156 = vsyncadd [#allocation3], 4294967040 }
  0xed   :  { %108 = vsyncpa [#allocation3], 1 }

// kernel: multi_head_attention.8
= control target key start
LH: loop header
LB: loop body
LE: loop exit
PB: predicated region body
PF: predicated region fallthrough
CT: control target
= control target key end

     0   :  { %10 = vsyncpa [#allocation3], 0  ;;  %s1357_s0 = inlined_call_operand.vmem [shape: bf16[2,4,8,8], index: 0, kind: input, shape index: {}]   ;;  %s1358_s1 = inlined_call_operand.vmem [shape: bf16[2,4,8,8], index: 1, kind: input, shape index: {}]   ;;  %s1359_s2 = inlined_call_operand.vmem [shape: bf16[2,4,8,8], index: 2, kind: input, shape index: {}]   ;;  %s1360_s3 = inlined_call_operand.vmem [shape: bf16[2,4,8,8], index: 3, kind: output, shape index: {0}]   ;;  %s1361_s4 = inlined_call_operand.hbm [shape: f32[2,4,8,8], index: 4, kind: output, shape index: {1}]  }
   0x1   :  { %12 = vsyncpa [#allocation3 + $0x1], 0  ;;  %s1171_s15 = smov 0   ;;  %s1173_s16 = smov 0  }
   0x2   :  { %s1175_s17 = smov 0   ;;  %s1177_s18 = smov 0  }
   0x3   :  { %s1179_s19 = smov 0   ;;  %s1181_s20 = smov 0  }
   0x4 LB: > { %s890_s21 = sadd.s32 4294967295, %s1139_s20   ;;  %s891_s22 = sadd.s32 4294967294, %s1139_s20   ;;  %s1139_s20 = sphi %s1181_s20, %s18_s20   ;;  %s1135_s19 = sphi %s1179_s19, %s1368_s19   ;;  %s1131_s18 = sphi %s1177_s18, %s1367_s18   ;;  %s1127_s17 = sphi %s1175_s17, %s1366_s17   ;;  %s1123_s16 = sphi %s1173_s16, %s1365_s16   ;;  %s1119_s15 = sphi %s1171_s15, %s1364_s15  }
   0x5   : > { %s30_s23 = sadd.s32 1, %s1135_s19  ;;  %s147_s24 = sadd.s32 1, %s1127_s17 }
   0x6   : > { %p32_p0 = scmp.ge.s32.totalorder %s30_s23, 2  ;;  %p157_p1 = scmp.ne.s32.totalorder %s1127_s17, %s1123_s16 }
   0x7   : > { %p158_p2 = scmp.eq.s32.totalorder %s890_s21, 1  ;;  %p163_p3 = scmp.ne.s32.totalorder %s1123_s16, %s1119_s15 }
   0x8   : > { %s1370_s23 = smov (%p32_p0, %s30_s23), 0  ;;  %p164_p5 = scmp.eq.s32.totalorder %s891_s22, 1 }
   0x9   : > { %p1211_p4 = por %p158_p2, %p157_p1  ;;  %s142_s26 = ssub.s32 %s1135_s19, %s1370_s23 }
   0xa   : > { %p894_p6 = scmp.ge.s32.totalorder %s1139_s20, 1  ;;  %p145_p7 = scmp.eq.s32.totalorder %s142_s26, 0 }
   0xb   : > { %p1218_p8 = por %p164_p5, %p163_p3  ;;  %p209_p9 = scmp.lt.s32.totalorder %s1139_s20, 3 }
   0xc   : > { %s1224_s28 = scalar_select %p145_p7, %s1127_s17, %s147_s24  }
   0xd   : > { %p210_p10 = pnand %p894_p6, %p209_p9 }
   0xe   : > { %p256_p11 = scmp.lt.s32.totalorder (!%p210_p10), %s1131_s18, 1  ;;  %v1141_v0 = vmov (!%p210_p10), 0.0   ;;  %vm1142_vm0 = vmmov (!%p210_p10), 0   ;;  %vm295_vm1 = vcmask (!%p210_p10), 64512   ;;  %vm535_vm2 = vcmask (!%p210_p10), 1043456   ;;  %s253_s14 = sand.u32 (!%p210_p10), 1, %s1123_s16  }
   0xf   : > { %213 = sbr.rel (%p210_p10) target bundleno = 790 (0x316), region = 32  ;;  %938 = vmatprep.subr.bf16.mxu0 (!%p210_p10), %v1141_v0  ;;  %944 = vmatprep.subr.bf16.mxu1 (!%p210_p10), %v1141_v0  ;;  %s895_s21 = sshll.u32 (!%p210_p10), %s253_s14, 5 }
  0x10   : > { %940 = vmatprep.mubr.msk.bf16.mxu0 (!%p210_p10), %vm1142_vm0, %v1141_v0  ;;  %946 = vmatprep.mubr.msk.bf16.mxu1 (!%p210_p10), %vm1142_vm0, %v1141_v0  ;;  %s255_s22 = scalar_lea.vmem (!%p210_p10), [#allocation2], %s895_s21  ;;  %s921_s24 = sshll.u32 (!%p210_p10), %s1131_s18, 9 }
  0x11   : > { %s752_s26 = sshll.u32 (!%p210_p10), %s255_s22, 4  ;;  %s1297_s6 = scalar_lea.hbm (!%p210_p10), %s1361_s4, %s921_s24  ;;  %s1299_s26 = int_to_ptr.vmem [resolvable:$true] %s752_s26 }
  0x12   : > { %s1061_s8 = scalar_lea.vmem (!%p210_p10), %s1299_s26, 512 }
  0x13   : > { %p1062_p12 = scmp.ne.s32.totalorder (!%p210_p10), %s1299_s26, %s1061_s8 }
  0x15   : > { %p1063_p13 = pnand (!%p210_p10), %p1062_p12, %p1211_p4 }
  0x16   : > { %s257_s29 = scalar_select %p256_p11, %s1131_s18, 1 }
  0x17   : > { %p1064_p0 = pneg %p1063_p13  ;;  %s1143_s18 = smov [#allocation2]  }
  0x18   : > { %s1234_s30 = sshll.u32 %s257_s29, 4  ;;  %s1065_s9 = sshll.u32 %s1143_s18, 4  ;;  %s1066_s9 = int_to_ptr.vmem [resolvable:$false] %s1065_s9 }
  0x19   : > { %s268_s7 = scalar_lea.vmem %s1358_s1, %s1234_s30  ;;  %s263_s10 = scalar_lea.vmem %s1357_s0, %s1234_s30 }
  0x1a   : > { %v287_v1 = vld [vmem:[%s268_s7] sm:$0xf]  ;;  %v288_v2 = vld [vmem:[%s268_s7 + $0x4] sm:$0xf]  ;;  %v289_v5 = vld [vmem:[%s268_s7 + $0x8] sm:$0xf]  ;;  %s273_s13 = scalar_lea.vmem %s1359_s2, %s1234_s30  ;;  %p1068_p1 = scmp.lt.s32.totalorder %s1299_s26, %s1066_s9 }
  0x1b   : > { %v300_v3 = vsel %vm295_vm1, %v287_v1, 0  ;;  %v346_v4 = vsel %vm295_vm1, %v288_v2, 0  ;;  %v290_v6 = vld [vmem:[%s268_s7 + $0xc] sm:$0xf]  ;;  %v283_v7 = vld [vmem:[%s263_s10] sm:$0xf] }
  0x1c   : > { %939 = vmatpush3.bf16.xpose.msra.mxu0 %v300_v3  ;;  %945 = vmatpush3.bf16.xpose.msra.mxu1 %v346_v4  ;;  %v284_v8 = vld [vmem:[%s263_s10 + $0x4] sm:$0xf]  ;;  %v392_v9 = vsel %vm295_vm1, %v289_v5, 0  ;;  %v438_v10 = vsel %vm295_vm1, %v290_v6, 0  ;;  %v285_v11 = vld [vmem:[%s263_s10 + $0x8] sm:$0xf] }
  0x1d   : > { %950 = vmatprep.subr.bf16.mxu0 %v1141_v0  ;;  %956 = vmatprep.subr.bf16.mxu1 %v1141_v0  ;;  %v286_v12 = vld [vmem:[%s263_s10 + $0xc] sm:$0xf]  ;;  %v291_v53 = vld [vmem:[%s273_s13] sm:$0xf]  ;;  %v292_v55 = vld [vmem:[%s273_s13 + $0x4] sm:$0xf] }
  0x1e   : > { %v537_v54 = vsel %vm535_vm2, %v291_v53, 0  ;;  %v583_v56 = vsel %vm535_vm2, %v292_v55, 0  ;;  %v293_v57 = vld [vmem:[%s273_s13 + $0x8] sm:$0xf]  ;;  %v294_v59 = vld [vmem:[%s273_s13 + $0xc] sm:$0xf] }
  0x1f   : > { %v629_v58 = vsel %vm535_vm2, %v293_v57, 0  ;;  %v675_v60 = vsel %vm535_vm2, %v294_v59, 0  ;;  %s1303_s7 = scalar_lea.sflag [#allocation3], %s253_s14  ;;  %s1067_s10 = scalar_lea.vmem %s1066_s9, 1024 }
  0x20   : > { %p1069_p2 = scmp.lt.s32.totalorder %s1067_s10, %s1061_s8 }
  0x22   : > { %p1070_p3 = por %p1069_p2, %p1068_p1 }
  0x23   : > { %941 = vmatmul.mubr.msk.bf16.vlgmr.msra.gmra.mrb[0].mxu0 %vm295_vm1, %v283_v7  ;;  %947 = vmatmul.mubr.msk.bf16.vlgmr.msra.gmra.mrb[0].mxu1 %vm295_vm1, %v284_v8 }
  0x24   : > { %951 = vmatpush3.bf16.xpose.msra.mxu0 %v392_v9  ;;  %957 = vmatpush3.bf16.xpose.msra.mxu1 %v438_v10  ;;  %p1071_p5 = pnand %p1070_p3, %p1064_p0 }
  0x25   : > { %952 = vmatprep.mubr.msk.bf16.mxu0 %vm1142_vm0, %v1141_v0  ;;  %958 = vmatprep.mubr.msk.bf16.mxu1 %vm1142_vm0, %v1141_v0 }
  0x26   : > { %962 = vmatprep.subr.bf16.mxu0 %v1141_v0  ;;  %968 = vmatprep.subr.bf16.mxu1 %v1141_v0 }
  0x2b   : > { %953 = vmatmul.mubr.msk.bf16.vlgmr.msra.gmra.mrb[4].mxu0 %vm295_vm1, %v285_v11  ;;  %959 = vmatmul.mubr.msk.bf16.vlgmr.msra.gmra.mrb[4].mxu1 %vm295_vm1, %v286_v12 }
  0x2c   : > { %964 = vmatprep.mubr.msk.bf16.mxu0 %vm1142_vm0, %v1141_v0  ;;  %970 = vmatprep.mubr.msk.bf16.mxu1 %vm1142_vm0, %v1141_v0 }
  0x2d   : > { %963 = vmatpush3.bf16.msra.mxu0 %v537_v54  ;;  %969 = vmatpush3.bf16.msra.mxu1 %v583_v56 }
  0x2e   : > { %974 = vmatprep.subr.bf16.mxu0 %v1141_v0  ;;  %980 = vmatprep.subr.bf16.mxu1 %v1141_v0 }
  0xf6   : > { %v336_v13 = vpop.f32.mrb[0].mxu0  ;;  %v382_v14 = vpop.f32.mrb[0].mxu1 }
  0xf7   : > { %v942_v15 = vpop.f32.mrb[1].mxu0  ;;  %v480_v16 = vsel %vm295_vm1, %v336_v13, -inf  ;;  %v948_v17 = vpop.f32.mrb[1].mxu1  ;;  %v483_v22 = vsel %vm295_vm1, %v382_v14, -inf }
  0xf8   : > { %481 = vmax.xlane.f32.xlu0 %v480_v16  ;;  %v339_v18 = vpop.f32.mrb[2].mxu0  ;;  %v385_v19 = vpop.f32.mrb[2].mxu1 }
  0xf9   : > { %v943_v20 = vpop.f32.mrb[3].mxu0  ;;  %v949_v21 = vpop.f32.mrb[3].mxu1 }
  0xfc   : > { %484 = vmax.xlane.f32.xlu0 %v483_v22 }
  0xfe   : > { %v428_v23 = vpop.f32.mrb[4].mxu0  ;;  %v474_v24 = vpop.f32.mrb[4].mxu1 }
  0xff   : > { %v954_v25 = vpop.f32.mrb[5].mxu0  ;;  %v486_v26 = vsel %vm295_vm1, %v428_v23, -inf  ;;  %v960_v27 = vpop.f32.mrb[5].mxu1  ;;  %v489_v32 = vsel %vm295_vm1, %v474_v24, -inf }
 0x100   : > { %487 = vmax.xlane.f32.xlu1 %v486_v26  ;;  %v431_v28 = vpop.f32.mrb[6].mxu0  ;;  %v477_v29 = vpop.f32.mrb[6].mxu1 }
 0x101   : > { %v955_v30 = vpop.f32.mrb[7].mxu0  ;;  %v961_v31 = vpop.f32.mrb[7].mxu1 }
 0x104   : > { %490 = vmax.xlane.f32.xlu1 %v489_v32 }
 0x185   : > { %v482_v33 = vpop.xlane.xlu0 %481 }
 0x186   : > { %v492_v34 = vsub.f32 %v336_v13, %v482_v33 }
 0x188   : > { %v496_v35 = vmul.f32 1.442695, %v492_v34 }
 0x189   : > { %v485_v36 = vpop.xlane.xlu0 %484 }
 0x18a   : > { %1045 = vpow2.f32 %v496_v35  ;;  %v493_v37 = vsub.f32 %v382_v14, %v485_v36 }
 0x18c   : > { %v498_v38 = vmul.f32 1.442695, %v493_v37 }
 0x18d   : > { %v488_v39 = vpop.xlane.xlu1 %487 }
 0x18e   : > { %1047 = vpow2.f32 %v498_v38  ;;  %v494_v40 = vsub.f32 %v428_v23, %v488_v39 }
 0x190   : > { %v500_v41 = vmul.f32 1.442695, %v494_v40 }
 0x191   : > { %v491_v42 = vpop.xlane.xlu1 %490 }
 0x192   : > { %1049 = vpow2.f32 %v500_v41  ;;  %v495_v43 = vsub.f32 %v474_v24, %v491_v42 }
 0x194   : > { %v1046_v44 = vpop.eup %1045  ;;  %v502_v45 = vmul.f32 1.442695, %v495_v43 }
 0x195   : > { %v504_v46 = vsel %vm295_vm1, %v1046_v44, 0.0 }
 0x196   : > { %1051 = vpow2.f32 %v502_v45  ;;  %505 = vadd.xlane.f32.xlu0 %v504_v46 }
 0x198   : > { %v1048_v47 = vpop.eup %1047 }
 0x199   : > { %v507_v48 = vsel %vm295_vm1, %v1048_v47, 0.0 }
 0x19a   : > { %508 = vadd.xlane.f32.xlu1 %v507_v48 }
 0x19c   : > { %v1050_v49 = vpop.eup %1049 }
 0x19d   : > { %v510_v50 = vsel %vm295_vm1, %v1050_v49, 0.0 }
 0x19e   : > { %511 = vadd.xlane.f32.xlu0 %v510_v50 }
 0x1a0   : > { %v1052_v51 = vpop.eup %1051 }
 0x1a1   : > { %v513_v52 = vsel %vm295_vm1, %v1052_v51, 0.0 }
 0x1a2   : > { %514 = vadd.xlane.f32.xlu1 %v513_v52 }
 0x223   : > { %v506_v61 = vpop.xlane.xlu0 %505 }
 0x224   : > { %1053 = vrcp.f32 %v506_v61 }
 0x227   : > { %v509_v62 = vpop.xlane.xlu1 %508 }
 0x228   : > { %1055 = vrcp.f32 %v509_v62 }
 0x22b   : > { %v512_v63 = vpop.xlane.xlu0 %511 }
 0x22c   : > { %1057 = vrcp.f32 %v512_v63 }
 0x22e   : > { %v1054_v1 = vpop.eup %1053 }
 0x22f   : > { %v520_v2 = vmul.f32 %v1054_v1, %v1046_v44  ;;  %v515_v3 = vpop.xlane.xlu1 %514 }
 0x230   : > { %1059 = vrcp.f32 %v515_v3 }
 0x231   : > { %524 = vst.msk [vmem:[%s255_s22] sm:$0xff] %vm295_vm1, %v520_v2  ;;  %v528_v4 = vpack.c.bf16 %v520_v2, %v520_v2 }
 0x232   : > { %v1056_v5 = vpop.eup %1055 }
 0x233   : > { %v521_v6 = vmul.f32 %v1056_v5, %v1048_v47  ;;  %965 = vmatmul.mubr.msk.bf16.vlgmr.msra.gmra.mrb[8].mxu0 %vm295_vm1, %v528_v4 }
 0x234   : > { %975 = vmatpush3.bf16.msra.mxu0 %v629_v58  ;;  %976 = vmatprep.mubr.msk.bf16.mxu0 %vm1142_vm0, %v1141_v0 }
 0x235   : > { %525 = vst.msk [vmem:[%s255_s22 + $0x8] sm:$0xff] %vm295_vm1, %v521_v6  ;;  %v529_v7 = vpack.c.bf16 %v521_v6, %v521_v6 }
 0x236   : > { %v1058_v8 = vpop.eup %1057 }
 0x237   : > { %v522_v9 = vmul.f32 %v1058_v8, %v1050_v49  ;;  %971 = vmatmul.mubr.msk.bf16.vlgmr.msra.gmra.mrb[8].mxu1 %vm295_vm1, %v529_v7 }
 0x238   : > { %981 = vmatpush3.bf16.msra.mxu1 %v675_v60  ;;  %982 = vmatprep.mubr.msk.bf16.mxu1 %vm1142_vm0, %v1141_v0 }
 0x239   : > { %526 = vst.msk [vmem:[%s255_s22 + $0x10] sm:$0xff] %vm295_vm1, %v522_v9  ;;  %v530_v10 = vpack.c.bf16 %v522_v9, %v522_v9 }
 0x23a   : > { %v1060_v11 = vpop.eup %1059 }
 0x23b   : > { %v523_v12 = vmul.f32 %v1060_v11, %v1052_v51  ;;  %977 = vmatmul.mubr.msk.bf16.vlgmr.msra.gmra.mrb[12].mxu0 %vm295_vm1, %v530_v10 }
 0x23d   : > { %527 = vst.msk [vmem:[%s255_s22 + $0x18] sm:$0xff] %vm295_vm1, %v523_v12  ;;  %v531_v13 = vpack.c.bf16 %v523_v12, %v523_v12 }
 0x23f   : > { %983 = vmatmul.mubr.msk.bf16.vlgmr.msra.gmra.mrb[12].mxu1 %vm295_vm1, %v531_v13 }
 0x240   : > { %1074 = shalt.err (!%p1071_p5)
}
 0x241   : > { %s1075_s11 = scalar_lea.hbm %s1297_s6, 512  ;;  %s1079_s14 = scalar_lea.hbm %s1361_s4, 1024 }
 0x242   : > { %p1076_p6 = scmp.ne.s32.totalorder %s1297_s6, %s1075_s11  ;;  %p1080_p10 = scmp.lt.u32.totalorder %s1297_s6, %s1361_s4 }
 0x243   : > { %p1081_p11 = scmp.lt.u32.totalorder %s1079_s14, %s1075_s11  ;;  %p1083_p13 = scmp.lt.u32.totalorder %s1075_s11, %s1297_s6 }
 0x244   : > { %p1077_p7 = pnand %p1076_p6, %p1211_p4 }
 0x245   : > { %p1082_p12 = por %p1081_p11, %p1080_p10 }
 0x246   : > { %p1078_p9 = pneg %p1077_p7 }
 0x247   : > { %p1084_p0 = por %p1083_p13, %p1082_p12 }
 0x249   : > { %p1085_p1 = pnand %p1084_p0, %p1078_p9 }
 0x24b   : > { %1088 = shalt.err (!%p1085_p1)
}
 0x24c   : > { %s1144_s24 = smov 128   ;;  %s1145_s29 = smov 8   ;;  %vm721_vm3 = vcmask 60416  }
 0x24d   : > { %986 = dma.vmem_to_hbm [thread:$0]  (%p1211_p4), %s1299_s26, 512, %s1297_s6, %s1303_s7, %s1144_s24, %s1144_s24, %s1145_s29  }
 0x24e   : > { %s281_s18 = scalar_lea.vmem %s1360_s3, %s1234_s30 }
 0x306   : > { %v573_v0 = vpop.f32.mrb[8].mxu0 }
 0x307   : > { %v717_v14 = vpack.c.bf16 %v573_v0, %v573_v0  ;;  %v966_v15 = vpop.f32.mrb[9].mxu0 }
 0x308   : > { %v576_v16 = vpop.f32.mrb[10].mxu0 }
 0x309   : > { %722 = vst.msk [vmem:[%s281_s18] sm:$0xf] %vm721_vm3, %v717_v14  ;;  %v967_v17 = vpop.f32.mrb[11].mxu0 }
 0x30a   : > { %v619_v18 = vpop.f32.mrb[8].mxu1 }
 0x30b   : > { %v718_v19 = vpack.c.bf16 %v619_v18, %v619_v18  ;;  %v972_v20 = vpop.f32.mrb[9].mxu1 }
 0x30c   : > { %v622_v21 = vpop.f32.mrb[10].mxu1 }
 0x30d   : > { %723 = vst.msk [vmem:[%s281_s18 + $0x4] sm:$0xf] %vm721_vm3, %v718_v19  ;;  %v973_v22 = vpop.f32.mrb[11].mxu1 }
 0x30e   : > { %v665_v23 = vpop.f32.mrb[12].mxu0 }
 0x30f   : > { %v719_v24 = vpack.c.bf16 %v665_v23, %v665_v23  ;;  %v978_v25 = vpop.f32.mrb[13].mxu0 }
 0x310   : > { %v668_v26 = vpop.f32.mrb[14].mxu0 }
 0x311   : > { %724 = vst.msk [vmem:[%s281_s18 + $0x8] sm:$0xf] %vm721_vm3, %v719_v24  ;;  %v979_v27 = vpop.f32.mrb[15].mxu0 }
 0x312   : > { %v711_v28 = vpop.f32.mrb[12].mxu1 }
 0x313   : > { %v720_v29 = vpack.c.bf16 %v711_v28, %v711_v28  ;;  %v984_v30 = vpop.f32.mrb[13].mxu1 }
 0x314   : > { %v714_v31 = vpop.f32.mrb[14].mxu1 }
 0x315   : > { %725 = vst.msk [vmem:[%s281_s18 + $0xc] sm:$0xf] %vm721_vm3, %v720_v29  ;;  %v985_v32 = vpop.f32.mrb[15].mxu1 }
 0x316 PF: > { %p992_p4 = scmp.ge.s32.totalorder %s1139_s20, 2  ;;  %s778_s25 = sand.u32 1, %s1119_s15  }
 0x317   : > { %s779_s30 = scalar_lea.sflag [#allocation3], %s778_s25 }
 0x318   : > { %p989_p2 = pnand %p992_p4, %p1218_p8 }
 0x31a   : > { %1114 = dma.done.wait (!%p989_p2), %s779_s30, 512  }
 0x31b   : > { %1116 = vsyncadd (!%p989_p2), %s779_s30, 4294966784  ;;  %s18_s20 = sadd.s32 1, %s1139_s20   ;;  %s1364_s15 = smov %s1123_s16 }
 0x31c   : > { %p15_p3 = scmp.ge.s32.totalorder %s18_s20, 4   ;;  %s1365_s16 = smov %s1127_s17 }
 0x31d   : > { %s1366_s17 = smov %s1224_s28  ;;  %s1367_s18 = smov %s1135_s19 }
 0x31e   : > { %s1368_s19 = smov %s1370_s23  ;;  %17 = sbr.rel (!%p15_p3) target bundleno = 4 (0x4), region = 85 }
 0x325   :  { %784 = vsyncpa [#allocation3], 1 }
 0x326   :  { %786 = vsyncpa [#allocation3 + $0x1], 1 }

</bundles_post_ra>
